<compile_context>
chip_gen: v7x
topology: tpu7x:2x2x1
jax: 0.10.0
libtpu: 0.0.40
codegen_flags: <defaults>
</compile_context>

<pallas_src>
import jax
import jax.numpy as jnp
from jax.experimental import pallas as pl
from jax.experimental.pallas import tpu as pltpu


def _round_up(n, m):
    return ((n + m - 1) // m) * m


def _mlp_kernel(x_ref, w1_ref, b1_ref, w2_ref, b2_ref, w3_ref, b3_ref, o_ref):
    # fc1: bf16 operands, f32 accumulate; bias + sigmoid in f32.
    z1 = jnp.dot(x_ref[...], w1_ref[...], preferred_element_type=jnp.float32)
    z1 = z1 + b1_ref[...]
    h1 = pl.reciprocal(1.0 + jnp.exp(-z1), approx=True)          # sigmoid (EUP)

    # fc2
    z2 = jnp.dot(h1.astype(jnp.bfloat16), w2_ref[...],
                 preferred_element_type=jnp.float32)
    z2 = z2 + b2_ref[...]
    h2 = pl.reciprocal(1.0 + jnp.exp(-z2), approx=True)          # sigmoid (EUP)

    # fc3 + exact sigmoid on the output
    z3 = jnp.dot(h2.astype(jnp.bfloat16), w3_ref[...],
                 preferred_element_type=jnp.float32)
    o_ref[...] = jax.nn.sigmoid(z3 + b3_ref[...]).astype(o_ref.dtype)


def _pad2(a, rows, cols, dtype):
    a = a.astype(dtype)
    return jnp.pad(a, ((0, rows - a.shape[0]), (0, cols - a.shape[1])))


def deep_logic_net_forward(x, params, *, tile_b=None):
    """Fused 3-layer MLP forward.

    x: (B, F_in) float32
    params: w1 (F_in, H), b1 (1, H), w2 (H, H), b2 (1, H), w3 (H, O), b3 (1, O)
            (weights stored transposed vs. PyTorch so the kernel does x @ W).
    """
    w1, b1 = params["w1"], params["b1"]
    w2, b2 = params["w2"], params["b2"]
    w3, b3 = params["w3"], params["b3"]

    B, F_in = x.shape
    H = w1.shape[1]
    O = w3.shape[1]

    # Lane-dense (multiple-of-128) feature dims.
    F_pad = _round_up(F_in, 128)
    H_pad = _round_up(H, 128)
    O_pad = _round_up(O, 128)

    # Pick a batch tile sized against a conservative VMEM budget:
    # resident bf16 weights + f32 biases + double-buffered x (bf16) and out (f32).
    if tile_b is None:
        weight_bytes = 2 * (F_pad * H_pad + H_pad * H_pad + H_pad * O_pad) \
                       + 4 * (2 * H_pad + O_pad)
        per_row_bytes = 2 * (F_pad * 2) + 2 * (O_pad * 4)
        budget = 20 * 1024 * 1024
        max_rows = max(8, (budget - weight_bytes) // per_row_bytes)
        tile_b = int(min(512, _round_up(B, 8), (max_rows // 8) * 8))
        tile_b = max(8, tile_b)
    B_pad = _round_up(B, tile_b)

    # Zero-pad everything; matmul operands in bf16, biases in f32.
    xp = _pad2(x, B_pad, F_pad, jnp.bfloat16)
    w1p = _pad2(w1, F_pad, H_pad, jnp.bfloat16)
    w2p = _pad2(w2, H_pad, H_pad, jnp.bfloat16)
    w3p = _pad2(w3, H_pad, O_pad, jnp.bfloat16)
    b1p = _pad2(b1, 1, H_pad, jnp.float32)
    b2p = _pad2(b2, 1, H_pad, jnp.float32)
    b3p = _pad2(b3, 1, O_pad, jnp.float32)

    grid = (B_pad // tile_b,)

    out_pad = pl.pallas_call(
        _mlp_kernel,
        out_shape=jax.ShapeDtypeStruct((B_pad, O_pad), x.dtype),
        grid_spec=pltpu.PrefetchScalarGridSpec(
            num_scalar_prefetch=0,
            grid=grid,
            in_specs=[
                pl.BlockSpec((tile_b, F_pad), lambda i: (i, 0)),   # x tile
                pl.BlockSpec((F_pad, H_pad), lambda i: (0, 0)),    # w1 (resident)
                pl.BlockSpec((1, H_pad), lambda i: (0, 0)),        # b1
                pl.BlockSpec((H_pad, H_pad), lambda i: (0, 0)),    # w2
                pl.BlockSpec((1, H_pad), lambda i: (0, 0)),        # b2
                pl.BlockSpec((H_pad, O_pad), lambda i: (0, 0)),    # w3
                pl.BlockSpec((1, O_pad), lambda i: (0, 0)),        # b3
            ],
            out_specs=pl.BlockSpec((tile_b, O_pad), lambda i: (i, 0)),
        ),
        compiler_params=pltpu.CompilerParams(
            dimension_semantics=("parallel",),
            vmem_limit_bytes=32 * 1024 * 1024,
        ),
    )(xp, w1p, b1p, w2p, b2p, w3p, b3p)

    # Drop batch / output padding.
    return out_pad[:B, :O]


def init_params(key, input_neurons, hidden_neurons, output_neurons):
    """uniform(-1, 1) init matching the PyTorch module; weights stored (in, out)."""
    k1, k2, k3, k4, k5, k6 = jax.random.split(key, 6)
    u = lambda k, shape: jax.random.uniform(
        k, shape, dtype=jnp.float32, minval=-1.0, maxval=1.0
    )
    return {
        "w1": u(k1, (input_neurons, hidden_neurons)),
        "b1": u(k2, (1, hidden_neurons)),
        "w2": u(k3, (hidden_neurons, hidden_neurons)),
        "b2": u(k4, (1, hidden_neurons)),
        "w3": u(k5, (hidden_neurons, output_neurons)),
        "b3": u(k6, (1, output_neurons)),
    }


def _reference_forward(x, p):
    h = jax.nn.sigmoid(x @ p["w1"] + p["b1"])
    h = jax.nn.sigmoid(h @ p["w2"] + p["b2"])
    return jax.nn.sigmoid(h @ p["w3"] + p["b3"])


if __name__ == "__main__":
    # Small shapes implied by the module's forward: (batch, input_neurons).
    batch = 8
    input_neurons = 16
    hidden_neurons = 32
    output_neurons = 8

    key = jax.random.PRNGKey(0)
    kx, kp = jax.random.split(key)
    x = jax.random.normal(kx, (batch, input_neurons), dtype=jnp.float32)
    params = init_params(kp, input_neurons, hidden_neurons, output_neurons)

    out = deep_logic_net_forward(x, params)
    out = jax.block_until_ready(out)

    ref = _reference_forward(x, params)
    assert out.shape == (batch, output_neurons)
    # Loosened tolerance: matmul operands are bf16 (f32 accumulation) and the
    # hidden sigmoids use the EUP approx reciprocal.
    assert jnp.allclose(out, ref, atol=2e-2, rtol=2e-2)

    print("KERNEL_OK")
</pallas_src>

<mosaic_0001>
module attributes {stable_mosaic.version = 11 : i64} {
  func.func @_mlp_kernel(%arg0: i32, %arg1: memref<8x128xbf16, #tpu.memory_space<vmem>>, %arg2: memref<128x128xbf16, #tpu.memory_space<vmem>>, %arg3: memref<1x128xf32, #tpu.memory_space<vmem>>, %arg4: memref<128x128xbf16, #tpu.memory_space<vmem>>, %arg5: memref<1x128xf32, #tpu.memory_space<vmem>>, %arg6: memref<128x128xbf16, #tpu.memory_space<vmem>>, %arg7: memref<1x128xf32, #tpu.memory_space<vmem>>, %arg8: memref<8x128xf32, #tpu.memory_space<vmem>>) attributes {dimension_semantics = [#tpu.dimension_semantics<parallel>], iteration_bounds = array<i64: 1>, scalar_prefetch = 0 : i64, scratch_operands = 0 : i64, tpu.core_type = #tpu.core_type<tc>, window_params = [{transform_indices = @transform_0, window_bounds = array<i64: 8, 128>}, {pipeline_mode = #tpu.pipeline_mode<synchronous>, transform_indices = @transform_1, window_bounds = array<i64: 128, 128>}, {pipeline_mode = #tpu.pipeline_mode<synchronous>, transform_indices = @transform_2, window_bounds = array<i64: 1, 128>}, {pipeline_mode = #tpu.pipeline_mode<synchronous>, transform_indices = @transform_3, window_bounds = array<i64: 128, 128>}, {pipeline_mode = #tpu.pipeline_mode<synchronous>, transform_indices = @transform_4, window_bounds = array<i64: 1, 128>}, {pipeline_mode = #tpu.pipeline_mode<synchronous>, transform_indices = @transform_5, window_bounds = array<i64: 128, 128>}, {pipeline_mode = #tpu.pipeline_mode<synchronous>, transform_indices = @transform_6, window_bounds = array<i64: 1, 128>}, {transform_indices = @transform_7, window_bounds = array<i64: 8, 128>}]} {
    %c0 = arith.constant 0 : index
    %c0_0 = arith.constant 0 : index
    %0 = vector.load %arg1[%c0, %c0_0] : memref<8x128xbf16, #tpu.memory_space<vmem>>, vector<8x128xbf16>
    %c0_1 = arith.constant 0 : index
    %c0_2 = arith.constant 0 : index
    %1 = vector.load %arg2[%c0_1, %c0_2] : memref<128x128xbf16, #tpu.memory_space<vmem>>, vector<128x128xbf16>
    %cst = arith.constant dense<0.000000e+00> : vector<8x128xf32>
    %2 = tpu.matmul %0, %1, %cst {dimension_numbers = #tpu.dot_dimension_numbers<[1], [0], [0], [1], [0, 0, 1, 1], [], []>} : vector<8x128xbf16>, vector<128x128xbf16>, vector<8x128xf32> -> vector<8x128xf32>
    %c0_3 = arith.constant 0 : index
    %c0_4 = arith.constant 0 : index
    %3 = vector.load %arg3[%c0_3, %c0_4] : memref<1x128xf32, #tpu.memory_space<vmem>>, vector<1x128xf32>
    %4 = vector.broadcast %3 : vector<1x128xf32> to vector<8x128xf32>
    %5 = arith.addf %2, %4 : vector<8x128xf32>
    %cst_5 = arith.constant 0.000000e+00 : f32
    %6 = vector.broadcast %cst_5 : f32 to vector<8x128xf32>
    %7 = arith.subf %6, %5 : vector<8x128xf32>
    %8 = math.exp %7 : vector<8x128xf32>
    %cst_6 = arith.constant 1.000000e+00 : f32
    %9 = vector.broadcast %cst_6 : f32 to vector<8x128xf32>
    %10 = arith.addf %9, %8 : vector<8x128xf32>
    %11 = tpu.reciprocal %10 {approx = true} : vector<8x128xf32> -> vector<8x128xf32>
    %12 = arith.truncf %11 : vector<8x128xf32> to vector<8x128xbf16>
    %c0_7 = arith.constant 0 : index
    %c0_8 = arith.constant 0 : index
    %13 = vector.load %arg4[%c0_7, %c0_8] : memref<128x128xbf16, #tpu.memory_space<vmem>>, vector<128x128xbf16>
    %cst_9 = arith.constant dense<0.000000e+00> : vector<8x128xf32>
    %14 = tpu.matmul %12, %13, %cst_9 {dimension_numbers = #tpu.dot_dimension_numbers<[1], [0], [0], [1], [0, 0, 1, 1], [], []>} : vector<8x128xbf16>, vector<128x128xbf16>, vector<8x128xf32> -> vector<8x128xf32>
    %c0_10 = arith.constant 0 : index
    %c0_11 = arith.constant 0 : index
    %15 = vector.load %arg5[%c0_10, %c0_11] : memref<1x128xf32, #tpu.memory_space<vmem>>, vector<1x128xf32>
    %16 = vector.broadcast %15 : vector<1x128xf32> to vector<8x128xf32>
    %17 = arith.addf %14, %16 : vector<8x128xf32>
    %cst_12 = arith.constant 0.000000e+00 : f32
    %18 = vector.broadcast %cst_12 : f32 to vector<8x128xf32>
    %19 = arith.subf %18, %17 : vector<8x128xf32>
    %20 = math.exp %19 : vector<8x128xf32>
    %cst_13 = arith.constant 1.000000e+00 : f32
    %21 = vector.broadcast %cst_13 : f32 to vector<8x128xf32>
    %22 = arith.addf %21, %20 : vector<8x128xf32>
    %23 = tpu.reciprocal %22 {approx = true} : vector<8x128xf32> -> vector<8x128xf32>
    %24 = arith.truncf %23 : vector<8x128xf32> to vector<8x128xbf16>
    %c0_14 = arith.constant 0 : index
    %c0_15 = arith.constant 0 : index
    %25 = vector.load %arg6[%c0_14, %c0_15] : memref<128x128xbf16, #tpu.memory_space<vmem>>, vector<128x128xbf16>
    %cst_16 = arith.constant dense<0.000000e+00> : vector<8x128xf32>
    %26 = tpu.matmul %24, %25, %cst_16 {dimension_numbers = #tpu.dot_dimension_numbers<[1], [0], [0], [1], [0, 0, 1, 1], [], []>} : vector<8x128xbf16>, vector<128x128xbf16>, vector<8x128xf32> -> vector<8x128xf32>
    %c0_17 = arith.constant 0 : index
    %c0_18 = arith.constant 0 : index
    %27 = vector.load %arg7[%c0_17, %c0_18] : memref<1x128xf32, #tpu.memory_space<vmem>>, vector<1x128xf32>
    %28 = vector.broadcast %27 : vector<1x128xf32> to vector<8x128xf32>
    %29 = arith.addf %26, %28 : vector<8x128xf32>
    %30 = arith.negf %29 : vector<8x128xf32>
    %31 = math.exp %30 : vector<8x128xf32>
    %cst_19 = arith.constant 1.000000e+00 : f32
    %32 = vector.broadcast %cst_19 : f32 to vector<8x128xf32>
    %33 = arith.addf %32, %31 : vector<8x128xf32>
    %34 = arith.divf %32, %33 : vector<8x128xf32>
    %c0_20 = arith.constant 0 : index
    %c0_21 = arith.constant 0 : index
    %35 = vector.load %arg8[%c0_20, %c0_21] : memref<8x128xf32, #tpu.memory_space<vmem>>, vector<8x128xf32>
    tpu.vector_store %arg8[%c0_20, %c0_21], %34 {strides = array<i32>} : memref<8x128xf32, #tpu.memory_space<vmem>>, vector<8x128xf32>,
    return
  }
  func.func @transform_0(%arg0: i32) -> (i32, i32) {
    %c0_i32 = arith.constant 0 : i32
    %c0_i32_0 = arith.constant 0 : i32
    return %arg0, %c0_i32 : i32, i32
  }
  func.func @transform_1(%arg0: i32) -> (i32, i32) {
    %c0_i32 = arith.constant 0 : i32
    %c0_i32_0 = arith.constant 0 : i32
    %c0_i32_1 = arith.constant 0 : i32
    return %c0_i32, %c0_i32_0 : i32, i32
  }
  func.func @transform_2(%arg0: i32) -> (i32, i32) {
    %c0_i32 = arith.constant 0 : i32
    %c0_i32_0 = arith.constant 0 : i32
    %c0_i32_1 = arith.constant 0 : i32
    return %c0_i32, %c0_i32_0 : i32, i32
  }
  func.func @transform_3(%arg0: i32) -> (i32, i32) {
    %c0_i32 = arith.constant 0 : i32
    %c0_i32_0 = arith.constant 0 : i32
    %c0_i32_1 = arith.constant 0 : i32
    return %c0_i32, %c0_i32_0 : i32, i32
  }
  func.func @transform_4(%arg0: i32) -> (i32, i32) {
    %c0_i32 = arith.constant 0 : i32
    %c0_i32_0 = arith.constant 0 : i32
    %c0_i32_1 = arith.constant 0 : i32
    return %c0_i32, %c0_i32_0 : i32, i32
  }
  func.func @transform_5(%arg0: i32) -> (i32, i32) {
    %c0_i32 = arith.constant 0 : i32
    %c0_i32_0 = arith.constant 0 : i32
    %c0_i32_1 = arith.constant 0 : i32
    return %c0_i32, %c0_i32_0 : i32, i32
  }
  func.func @transform_6(%arg0: i32) -> (i32, i32) {
    %c0_i32 = arith.constant 0 : i32
    %c0_i32_0 = arith.constant 0 : i32
    %c0_i32_1 = arith.constant 0 : i32
    return %c0_i32, %c0_i32_0 : i32, i32
  }
  func.func @transform_7(%arg0: i32) -> (i32, i32) {
    %c0_i32 = arith.constant 0 : i32
    %c0_i32_0 = arith.constant 0 : i32
    return %arg0, %c0_i32 : i32, i32
  }
}

</mosaic_0001>

<bundles_post_ra>
// kernel: tpu_custom_call.1
= control target key start
LH: loop header
LB: loop body
LE: loop exit
PB: predicated region body
PF: predicated region fallthrough
CT: control target
= control target key end

     0   :  { %12 = vsyncpa [#allocation3], 0  ;;  %s886_s0 = inlined_call_operand.hbm [shape: bf16[8,128], index: 0, kind: input, shape index: {}]   ;;  %s887_s1 = inlined_call_operand.hbm [shape: bf16[128,128], index: 1, kind: input, shape index: {}]   ;;  %s888_s2 = inlined_call_operand.vmem [shape: f32[1,128], index: 2, kind: input, shape index: {}]   ;;  %s889_s3 = inlined_call_operand.hbm [shape: bf16[128,128], index: 3, kind: input, shape index: {}]   ;;  %s890_s4 = inlined_call_operand.vmem [shape: f32[1,128], index: 4, kind: input, shape index: {}]   ;;  %s891_s5 = inlined_call_operand.hbm [shape: bf16[128,128], index: 5, kind: input, shape index: {}]   ;;  %s892_s6 = inlined_call_operand.vmem [shape: f32[1,128], index: 6, kind: input, shape index: {}]   ;;  %s893_s7 = inlined_call_operand.hbm [shape: f32[8,128], index: 7, kind: output, shape index: {}]  }
   0x1   :  { %13 = vsyncpa [#allocation6], 0 }
   0x2   :  { %14 = vsyncpa [#allocation9], 0 }
   0x3   :  { %15 = vsyncpa [#allocation4], 0  ;;  %s729_s24 = smov [#allocation5]   ;;  %s611_s28 = scalar_lea.hbm %s887_s1, 1024 }
   0x4   :  { %s31_s25 = sshll.u32 %s729_s24, 4  ;;  %p612_p0 = scmp.ne.s32.totalorder %s887_s1, %s611_s28  ;;  %s32_s25 = int_to_ptr.vmem [resolvable:$true] %s31_s25 }
   0x5   :  { %p615_p1 = scmp.lt.u32.totalorder %s611_s28, %s887_s1 }
   0x7   :  { %p617_p2 = pnand %p615_p1, %p612_p0 }
   0x9   :  { %620 = shalt.err (!%p617_p2)
}
   0xa   :  { %s621_s10 = scalar_lea.vmem %s32_s25, 1024  ;;  %p626_p4 = scmp.lt.s32.totalorder %s32_s25, %s32_s25 }
   0xb   :  { %p622_p3 = scmp.ne.s32.totalorder %s32_s25, %s621_s10  ;;  %p627_p5 = scmp.lt.s32.totalorder %s621_s10, %s621_s10 }
   0xd   :  { %p628_p6 = por %p627_p5, %p626_p4 }
   0xf   :  { %p629_p7 = pnand %p628_p6, %p622_p3 }
  0x11   :  { %632 = shalt.err (!%p629_p7)
}
  0x12   :  { %s730_s11 = smov 64   ;;  %s731_s12 = smov 4  }
  0x13   :  { %37 = dma.hbm_to_vmem [thread:$0]  %s887_s1, 1024, %s32_s25, [#allocation6], %s730_s11, %s730_s11, %s731_s12  }
  0x14   :  { %s732_s15 = smov [#allocation2]   ;;  %s733_s17 = smov [#allocation7]  }
  0x15   :  { %s22_s16 = sshll.u32 %s732_s15, 4  ;;  %s45_s18 = sshll.u32 %s733_s17, 4  ;;  %s23_s16 = int_to_ptr.vmem [resolvable:$true] %s22_s16  ;;  %s46_s18 = int_to_ptr.vmem [resolvable:$true] %s45_s18 }
  0x16   :  { %s633_s21 = scalar_lea.hbm %s886_s0, 64 }
  0x17   :  { %p634_p8 = scmp.ne.s32.totalorder %s886_s0, %s633_s21  ;;  %p637_p9 = scmp.lt.u32.totalorder %s633_s21, %s886_s0 }
  0x19   :  { %p639_p10 = pnand %p637_p9, %p634_p8 }
  0x1b   :  { %642 = shalt.err (!%p639_p10)
}
  0x1c   :  { %s643_s1 = scalar_lea.vmem %s23_s16, 64  ;;  %p648_p12 = scmp.lt.s32.totalorder %s23_s16, %s23_s16 }
  0x1d   :  { %p644_p11 = scmp.ne.s32.totalorder %s23_s16, %s643_s1  ;;  %p649_p13 = scmp.lt.s32.totalorder %s643_s1, %s643_s1 }
  0x1f   :  { %p650_p0 = por %p649_p13, %p648_p12 }
  0x21   :  { %p651_p1 = pnand %p650_p0, %p644_p11 }
  0x23   :  { %654 = shalt.err (!%p651_p1)
}
  0x24   :  { %25 = dma.hbm_to_vmem [thread:$0]  %s886_s0, 64, %s23_s16, [#allocation3]  }
  0x25   :  { %s655_s30 = scalar_lea.hbm %s889_s3, 1024 }
  0x26   :  { %p656_p2 = scmp.ne.s32.totalorder %s889_s3, %s655_s30  ;;  %p659_p3 = scmp.lt.u32.totalorder %s655_s30, %s889_s3 }
  0x28   :  { %p661_p4 = pnand %p659_p3, %p656_p2 }
  0x2a   :  { %664 = shalt.err (!%p661_p4)
}
  0x2b   :  { %s665_s14 = scalar_lea.vmem %s46_s18, 1024  ;;  %p670_p6 = scmp.lt.s32.totalorder %s46_s18, %s46_s18 }
  0x2c   :  { %p666_p5 = scmp.ne.s32.totalorder %s46_s18, %s665_s14  ;;  %p671_p7 = scmp.lt.s32.totalorder %s665_s14, %s665_s14 }
  0x2e   :  { %p672_p8 = por %p671_p7, %p670_p6 }
  0x30   :  { %p673_p9 = pnand %p672_p8, %p666_p5 }
  0x32   :  { %676 = shalt.err (!%p673_p9)
}
  0x33   :  { %51 = dma.hbm_to_vmem [thread:$0]  %s889_s3, 1024, %s46_s18, [#allocation6], %s730_s11, %s730_s11, %s731_s12  }
  0x34   :  { %s734_s16 = smov [#allocation8]   ;;  %s677_s21 = scalar_lea.hbm %s891_s5, 1024 }
  0x35   :  { %s59_s17 = sshll.u32 %s734_s16, 4  ;;  %p678_p10 = scmp.ne.s32.totalorder %s891_s5, %s677_s21  ;;  %s60_s17 = int_to_ptr.vmem [resolvable:$true] %s59_s17 }
  0x36   :  { %p681_p11 = scmp.lt.u32.totalorder %s677_s21, %s891_s5 }
  0x38   :  { %p683_p12 = pnand %p681_p11, %p678_p10 }
  0x3a   :  { %686 = shalt.err (!%p683_p12)
}
  0x3b   :  { %s687_s1 = scalar_lea.vmem %s60_s17, 1024  ;;  %p692_p0 = scmp.lt.s32.totalorder %s60_s17, %s60_s17 }
  0x3c   :  { %p688_p13 = scmp.ne.s32.totalorder %s60_s17, %s687_s1  ;;  %p693_p1 = scmp.lt.s32.totalorder %s687_s1, %s687_s1 }
  0x3e   :  { %p694_p2 = por %p693_p1, %p692_p0 }
  0x40   :  { %p695_p3 = pnand %p694_p2, %p688_p13 }
  0x42   :  { %698 = shalt.err (!%p695_p3)
}
  0x43   :  { %65 = dma.hbm_to_vmem [thread:$0]  %s891_s5, 1024, %s60_s17, [#allocation9], %s730_s11, %s730_s11, %s731_s12  }
  0x44   :  { %721 = dma.done.wait [#allocation3], 64  }
  0x45   :  { %722 = vsyncadd [#allocation3], 4294967232 }
  0x46   :  { %723 = dma.done.wait [#allocation6], 2048  }
  0x47   :  { %724 = vsyncadd [#allocation6], 4294965248 }
  0x48   :  { %725 = dma.done.wait [#allocation9], 1024  }
  0x49   :  { %726 = vsyncadd [#allocation9], 4294966272  ;;  %v735_v0 = vmov 0.0   ;;  %vm736_vm0 = vmmov 0   ;;  %v575_v1 = vld [vmem:[#allocation5] sm:$0xff]   ;;  %v576_v2 = vld [vmem:[#allocation5 + $0x8] sm:$0xff]  }
  0x4a   :  { %506 = vmatprep.subr.bf16.mxu0 %v735_v0  ;;  %522 = vmatprep.mubr.msk.bf16.mxu0 %vm736_vm0, %v735_v0  ;;  %v577_v3 = vld [vmem:[#allocation5 + $0x10] sm:$0xff]   ;;  %v578_v4 = vld [vmem:[#allocation5 + $0x18] sm:$0xff]   ;;  %v579_v5 = vld [vmem:[#allocation5 + $0x20] sm:$0xff]  }
  0x4b   :  { %526 = vmatprep.subr.bf16.mxu1 %v735_v0  ;;  %542 = vmatprep.mubr.msk.bf16.mxu1 %vm736_vm0, %v735_v0  ;;  %v580_v6 = vld [vmem:[#allocation5 + $0x28] sm:$0xff]   ;;  %v581_v7 = vld [vmem:[#allocation5 + $0x30] sm:$0xff]   ;;  %v582_v8 = vld [vmem:[#allocation5 + $0x38] sm:$0xff]  }
  0x4c   :  { %507 = vmatpush3.bf16.msra.mxu0 %v575_v1  ;;  %v81_v9 = vld [vmem:[#allocation2] sm:$0xf]  ;;  %v583_v10 = vld [vmem:[#allocation7] sm:$0xff]   ;;  %v584_v11 = vld [vmem:[#allocation7 + $0x8] sm:$0xff]  }
  0x4d   :  { %508 = vmatprep.subr.bf16.mxu0 %v735_v0  ;;  %527 = vmatpush3.bf16.msra.mxu1 %v583_v10  ;;  %v585_v12 = vld [vmem:[#allocation7 + $0x10] sm:$0xff]   ;;  %v586_v13 = vld [vmem:[#allocation7 + $0x18] sm:$0xff]   ;;  %v587_v14 = vld [vmem:[#allocation7 + $0x20] sm:$0xff]  }
  0x4e   :  { %528 = vmatprep.subr.bf16.mxu1 %v735_v0  ;;  %v588_v15 = vld [vmem:[#allocation7 + $0x28] sm:$0xff]   ;;  %v589_v16 = vld [vmem:[#allocation7 + $0x30] sm:$0xff]   ;;  %v590_v17 = vld [vmem:[#allocation7 + $0x38] sm:$0xff]  }
  0x4f   :  { %v451_v18 = vld [vmem:[%s888_s2] ss:$0 sm:$0xff]  ;;  %v591_v30 = vld [vmem:[#allocation8] sm:$0xff]   ;;  %v592_v31 = vld [vmem:[#allocation8 + $0x8] sm:$0xff]  }
  0x50   :  { %509 = vmatpush3.bf16.msra.mxu0 %v576_v2  ;;  %v593_v32 = vld [vmem:[#allocation8 + $0x10] sm:$0xff]   ;;  %v594_v33 = vld [vmem:[#allocation8 + $0x18] sm:$0xff]   ;;  %v595_v34 = vld [vmem:[#allocation8 + $0x20] sm:$0xff]  }
  0x51   :  { %510 = vmatprep.subr.bf16.mxu0 %v735_v0  ;;  %529 = vmatpush3.bf16.msra.mxu1 %v584_v11  ;;  %v596_v35 = vld [vmem:[#allocation8 + $0x28] sm:$0xff]   ;;  %v597_v36 = vld [vmem:[#allocation8 + $0x30] sm:$0xff]   ;;  %v598_v37 = vld [vmem:[#allocation8 + $0x38] sm:$0xff]  }
  0x52   :  { %530 = vmatprep.subr.bf16.mxu1 %v735_v0  ;;  %v460_v38 = vld [vmem:[%s890_s4] ss:$0 sm:$0xff]  ;;  %s737_s4 = smov [#allocation10]  }
  0x53   :  { %v469_v50 = vld [vmem:[%s892_s6] ss:$0 sm:$0xff]  ;;  %s440_s28 = sshll.u32 %s737_s4, 4  ;;  %s441_s28 = int_to_ptr.vmem [resolvable:$true] %s440_s28 }
  0x54   :  { %511 = vmatpush3.bf16.msra.mxu0 %v577_v3  ;;  %s699_s29 = scalar_lea.vmem %s441_s28, 128  ;;  %p704_p5 = scmp.lt.s32.totalorder %s441_s28, %s441_s28 }
  0x55   :  { %512 = vmatprep.subr.bf16.mxu0 %v735_v0  ;;  %531 = vmatpush3.bf16.msra.mxu1 %v585_v12  ;;  %p700_p4 = scmp.ne.s32.totalorder %s441_s28, %s699_s29  ;;  %p705_p6 = scmp.lt.s32.totalorder %s699_s29, %s699_s29 }
  0x56   :  { %532 = vmatprep.subr.bf16.mxu1 %v735_v0 }
  0x57   :  { %p706_p7 = por %p705_p6, %p704_p5 }
  0x58   :  { %513 = vmatpush3.bf16.msra.mxu0 %v578_v4 }
  0x59   :  { %514 = vmatprep.subr.bf16.mxu0 %v735_v0  ;;  %533 = vmatpush3.bf16.msra.mxu1 %v586_v13  ;;  %p707_p8 = pnand %p706_p7, %p700_p4 }
  0x5a   :  { %534 = vmatprep.subr.bf16.mxu1 %v735_v0 }
  0x5c   :  { %515 = vmatpush3.bf16.msra.mxu0 %v579_v5 }
  0x5d   :  { %516 = vmatprep.subr.bf16.mxu0 %v735_v0  ;;  %535 = vmatpush3.bf16.msra.mxu1 %v587_v14 }
  0x5e   :  { %536 = vmatprep.subr.bf16.mxu1 %v735_v0 }
  0x60   :  { %517 = vmatpush3.bf16.msra.mxu0 %v580_v6 }
  0x61   :  { %518 = vmatprep.subr.bf16.mxu0 %v735_v0  ;;  %537 = vmatpush3.bf16.msra.mxu1 %v588_v15 }
  0x62   :  { %538 = vmatprep.subr.bf16.mxu1 %v735_v0 }
  0x64   :  { %519 = vmatpush3.bf16.msra.mxu0 %v581_v7 }
  0x65   :  { %520 = vmatprep.subr.bf16.mxu0 %v735_v0  ;;  %539 = vmatpush3.bf16.msra.mxu1 %v589_v16 }
  0x66   :  { %540 = vmatprep.subr.bf16.mxu1 %v735_v0 }
  0x68   :  { %521 = vmatpush3.bf16.msra.mxu0 %v582_v8 }
  0x69   :  { %546 = vmatprep.subr.bf16.mxu0 %v735_v0  ;;  %541 = vmatpush3.bf16.msra.mxu1 %v590_v17 }
  0x6b   :  { %523 = vmatmul.mubr.bf16.vlgmr.msra.gmra.mrb[0].mxu0 %v81_v9 }
  0x6c   :  { %562 = vmatprep.mubr.msk.bf16.mxu0 %vm736_vm0, %v735_v0  ;;  %547 = vmatpush3.bf16.msra.mxu0 %v591_v30 }
  0x6d   :  { %548 = vmatprep.subr.bf16.mxu0 %v735_v0 }
  0x70   :  { %549 = vmatpush3.bf16.msra.mxu0 %v592_v31 }
  0x71   :  { %550 = vmatprep.subr.bf16.mxu0 %v735_v0 }
  0x74   :  { %551 = vmatpush3.bf16.msra.mxu0 %v593_v32 }
  0x75   :  { %552 = vmatprep.subr.bf16.mxu0 %v735_v0 }
  0x78   :  { %553 = vmatpush3.bf16.msra.mxu0 %v594_v33 }
  0x79   :  { %554 = vmatprep.subr.bf16.mxu0 %v735_v0 }
  0x7c   :  { %555 = vmatpush3.bf16.msra.mxu0 %v595_v34 }
  0x7d   :  { %556 = vmatprep.subr.bf16.mxu0 %v735_v0 }
  0x80   :  { %557 = vmatpush3.bf16.msra.mxu0 %v596_v35 }
  0x81   :  { %558 = vmatprep.subr.bf16.mxu0 %v735_v0 }
  0x84   :  { %559 = vmatpush3.bf16.msra.mxu0 %v597_v36 }
  0x85   :  { %560 = vmatprep.subr.bf16.mxu0 %v735_v0 }
  0x88   :  { %561 = vmatpush3.bf16.msra.mxu0 %v598_v37 }
 0x13e   :  { %v187_v19 = vpop.f32.mrb[0].mxu0 }
 0x13f   :  { %v188_v20 = vadd.f32 %v451_v18, %v187_v19  ;;  %v524_v21 = vpop.f32.mrb[1].mxu0 }
 0x140   :  { %v190_v22 = vpop.f32.mrb[2].mxu0 }
 0x141   :  { %v193_v23 = vsub.f32 0.0, %v188_v20  ;;  %v525_v24 = vpop.f32.mrb[3].mxu0 }
 0x143   :  { %v194_v25 = vmul.f32 1.442695, %v193_v23 }
 0x145   :  { %599 = vpow2.f32 %v194_v25 }
 0x14f   :  { %v600_v26 = vpop.eup %599 }
 0x150   :  { %v196_v27 = vadd.f32 1.0, %v600_v26 }
 0x152   :  { %601 = vrcp.f32 %v196_v27 }
 0x15c   :  { %v602_v28 = vpop.eup %601 }
 0x15d   :  { %v198_v29 = vpack.c.bf16 %v602_v28, %v602_v28 }
 0x15f   :  { %543 = vmatmul.mubr.bf16.vlgmr.msra.gmra.mrb[0].mxu1 %v198_v29 }
 0x232   :  { %v304_v39 = vpop.f32.mrb[0].mxu1 }
 0x233   :  { %v305_v40 = vadd.f32 %v460_v38, %v304_v39  ;;  %v544_v41 = vpop.f32.mrb[1].mxu1 }
 0x234   :  { %v307_v42 = vpop.f32.mrb[2].mxu1 }
 0x235   :  { %v310_v43 = vsub.f32 0.0, %v305_v40  ;;  %v545_v44 = vpop.f32.mrb[3].mxu1 }
 0x237   :  { %v311_v45 = vmul.f32 1.442695, %v310_v43 }
 0x239   :  { %603 = vpow2.f32 %v311_v45 }
 0x243   :  { %v604_v46 = vpop.eup %603 }
 0x244   :  { %v313_v47 = vadd.f32 1.0, %v604_v46 }
 0x246   :  { %605 = vrcp.f32 %v313_v47 }
 0x250   :  { %v606_v48 = vpop.eup %605 }
 0x251   :  { %v315_v49 = vpack.c.bf16 %v606_v48, %v606_v48 }
 0x253   :  { %563 = vmatmul.mubr.bf16.vlgmr.msra.gmra.mrb[4].mxu0 %v315_v49 }
 0x326   :  { %v421_v51 = vpop.f32.mrb[4].mxu0 }
 0x327   :  { %v422_v52 = vadd.f32 %v469_v50, %v421_v51  ;;  %v564_v53 = vpop.f32.mrb[5].mxu0 }
 0x328   :  { %v424_v54 = vpop.f32.mrb[6].mxu0 }
 0x329   :  { %v478_v55 = vmul.f32 -1.442695, %v422_v52  ;;  %v565_v56 = vpop.f32.mrb[7].mxu0 }
 0x32b   :  { %607 = vpow2.f32 %v478_v55 }
 0x335   :  { %v608_v57 = vpop.eup %607 }
 0x336   :  { %v430_v58 = vadd.f32 1.0, %v608_v57 }
 0x338   :  { %609 = vrcp.f32 %v430_v58 }
 0x342   :  { %v610_v59 = vpop.eup %609 }
 0x343   :  { %433 = vst [vmem:[#allocation10] sm:$0xff] %v610_v59 }
 0x344   :  { %710 = shalt.err (!%p707_p8)
}
 0x345   :  { %s711_s8 = scalar_lea.hbm %s893_s7, 128 }
 0x346   :  { %p712_p9 = scmp.ne.s32.totalorder %s893_s7, %s711_s8  ;;  %p715_p10 = scmp.lt.u32.totalorder %s711_s8, %s893_s7 }
 0x348   :  { %p717_p11 = pnand %p715_p10, %p712_p9 }
 0x34a   :  { %720 = shalt.err (!%p717_p11)
}
 0x34b   :  { %443 = dma.vmem_to_hbm [thread:$0]  %s441_s28, 128, %s893_s7, [#allocation4]  }
 0x34c   :  { %727 = dma.done.wait [#allocation4], 128  }
 0x34d   :  { %728 = vsyncadd [#allocation4], 4294967168 }
 0x34e   :  { %447 = vsyncpa [#allocation3], 1 }
 0x34f   :  { %448 = vsyncpa [#allocation6], 1 }
 0x350   :  { %449 = vsyncpa [#allocation9], 1 }
 0x351   :  { %450 = vsyncpa [#allocation4], 1 }

</bundles_post_ra>
